<compile_context>
chip_gen: v6e
topology: v6e:2x2x1
jax: 0.10.0
libtpu: 0.0.40
codegen_flags: <defaults>
</compile_context>

<pallas_src>
import math

import jax
import jax.numpy as jnp
from jax.experimental import pallas as pl
from jax.experimental.pallas import tpu as pltpu

SQRT_HALF = math.sqrt(0.5)
_LANE = 128


def _round_up(x: int, m: int) -> int:
    return ((x + m - 1) // m) * m


def _make_fused_kernel(no_first_residual: bool, c_out: int):
    """One matmul per GLU layer (RHS width 2*c_out, a multiple of 128) followed
    by a lane-aligned slice of the result.  Used when c_out % 128 == 0."""

    def kernel(x_ref, w1_ref, w2_ref, o_ref):
        x = x_ref[...]

        # ---- GLU layer 0: y = x @ W1, g = y_a * sigmoid(y_b) ----
        y = jnp.dot(x, w1_ref[...], preferred_element_type=jnp.float32)
        g = y[:, :c_out] * jax.nn.sigmoid(y[:, c_out:])
        h = g if no_first_residual else x.astype(jnp.float32) * SQRT_HALF + g

        # ---- GLU layer 1 (always has the residual) ----
        y2 = jnp.dot(h.astype(x_ref.dtype), w2_ref[...],
                     preferred_element_type=jnp.float32)
        out = h * SQRT_HALF + y2[:, :c_out] * jax.nn.sigmoid(y2[:, c_out:])

        o_ref[...] = out.astype(o_ref.dtype)

    return kernel


def _make_split_kernel(no_first_residual: bool):
    """GLU halves as two separate matmuls (no lane-axis slicing of the matmul
    result).  Used when c_out is not a multiple of 128."""

    def kernel(x_ref, w1a_ref, w1b_ref, w2a_ref, w2b_ref, o_ref):
        x = x_ref[...]

        # ---- GLU layer 0 ----
        g = (jnp.dot(x, w1a_ref[...], preferred_element_type=jnp.float32)
             * jax.nn.sigmoid(
                 jnp.dot(x, w1b_ref[...], preferred_element_type=jnp.float32)))
        h = g if no_first_residual else x.astype(jnp.float32) * SQRT_HALF + g

        # ---- GLU layer 1 (always has the residual) ----
        h_in = h.astype(x_ref.dtype)
        out = h * SQRT_HALF + (
            jnp.dot(h_in, w2a_ref[...], preferred_element_type=jnp.float32)
            * jax.nn.sigmoid(
                jnp.dot(h_in, w2b_ref[...], preferred_element_type=jnp.float32)))

        o_ref[...] = out.astype(o_ref.dtype)

    return kernel


def glu_block_forward(x, w1_t, w2_t, *, no_first_residual: bool = False,
                      tile_n: int | None = None):
    """GLUBlock forward (num_glu_layers == 2).

    x:    [N, C_in]
    w1_t: [C_in, 2*C_out]   (torch Linear weight, transposed)
    w2_t: [C_out, 2*C_out]
    """
    n, c_in = x.shape
    two_c_out = w1_t.shape[1]
    c_out = two_c_out // 2
    assert w1_t.shape[0] == c_in
    assert w2_t.shape == (c_out, two_c_out)
    if not no_first_residual:
        # Residual on layer 0 requires matching channel counts (same as torch).
        assert c_in == c_out

    dtype = x.dtype
    itemsize = jnp.dtype(dtype).itemsize
    w1_t = w1_t.astype(dtype)
    w2_t = w2_t.astype(dtype)

    # Sublane alignment for the batch tile (8 for f32, 16 for bf16, ...).
    sub = max(8, 32 // itemsize)

    def _vmem_bytes(t: int) -> int:
        io = 2 * t * (c_in + c_out) * itemsize          # double-buffered x/out
        w = (c_in + c_out) * two_c_out * itemsize       # weights, Buffered(1)
        tmp = 6 * t * max(c_in, two_c_out) * 4          # f32 intermediates
        return io + w + tmp

    if tile_n is None:
        # Aim for >= ~8 grid steps; tiles in [256, 1024] rows already reach
        # ~85% of HBM roofline while keeping vreg/VMEM pressure low.
        tile_n = min(1024, max(256, _round_up(pl.cdiv(n, 8), sub)))
    tile_n = _round_up(max(int(tile_n), sub), sub)
    # Shrink the tile if the VMEM footprint would be too large (v5e default
    # scoped limit is 16 MiB; v7x has only 64 MiB physical VMEM).
    while tile_n > sub and _vmem_bytes(tile_n) > 24 * 1024 * 1024:
        tile_n = _round_up(tile_n // 2, sub)
    if tile_n >= n:
        tile_n = n  # single full block (legal: block dim == array dim)
    grid = pl.cdiv(n, tile_n)

    vmem_limit = int(min(64 * 1024 * 1024,
                         max(32 * 1024 * 1024, 2 * _vmem_bytes(tile_n))))

    fused = (c_out % _LANE == 0)
    if fused:
        kernel = _make_fused_kernel(no_first_residual, c_out)
        weights = (w1_t, w2_t)
        w_shapes = ((c_in, two_c_out), (c_out, two_c_out))
    else:
        kernel = _make_split_kernel(no_first_residual)
        weights = (w1_t[:, :c_out], w1_t[:, c_out:],
                   w2_t[:, :c_out], w2_t[:, c_out:])
        w_shapes = ((c_in, c_out), (c_in, c_out),
                    (c_out, c_out), (c_out, c_out))

    # Weights are grid-invariant: keep them single-buffered and VMEM-resident.
    w_specs = [
        pl.BlockSpec(s, lambda i: (0, 0), pipeline_mode=pl.Buffered(1))
        for s in w_shapes
    ]

    cost = pl.CostEstimate(
        flops=2 * n * (c_in + c_out) * two_c_out,
        transcendentals=2 * n * c_out,
        bytes_accessed=itemsize * (n * (c_in + c_out)
                                   + (c_in + c_out) * two_c_out),
    )

    out = pl.pallas_call(
        kernel,
        out_shape=jax.ShapeDtypeStruct((n, c_out), dtype),
        grid_spec=pl.GridSpec(
            grid=(grid,),
            in_specs=[pl.BlockSpec((tile_n, c_in), lambda i: (i, 0))] + w_specs,
            out_specs=pl.BlockSpec((tile_n, c_out), lambda i: (i, 0)),
        ),
        compiler_params=pltpu.CompilerParams(
            dimension_semantics=("parallel",),
            vmem_limit_bytes=vmem_limit,
        ),
        cost_estimate=cost,
    )(x, *weights)

    return out


def _reference(x, w1_t, w2_t, no_first_residual=False):
    """Pure-JAX reference mirroring the PyTorch forward (f32, exact matmuls)."""
    c_out = w1_t.shape[1] // 2
    xf = x.astype(jnp.float32)

    def glu_layer(h, w_t):
        y = jnp.dot(h, w_t.astype(jnp.float32),
                    precision=jax.lax.Precision.HIGHEST)
        return y[:, :c_out] * jax.nn.sigmoid(y[:, c_out:])

    if no_first_residual:
        h = glu_layer(xf, w1_t)
    else:
        h = xf * SQRT_HALF + glu_layer(xf, w1_t)
    return h * SQRT_HALF + glu_layer(h, w2_t)


def _init_linear_weight_t(key, in_channels, out_features):
    """torch.nn.Linear.reset_parameters-style init (kaiming_uniform a=sqrt(5)),
    returned already transposed: shape [in_channels, out_features]."""
    bound = 1.0 / math.sqrt(in_channels)
    return jax.random.uniform(
        key, (in_channels, out_features), jnp.float32, minval=-bound, maxval=bound
    )


if __name__ == "__main__":
    root = jax.random.PRNGKey(0)
    keys = jax.random.split(root, 3)

    def run_case(batch, c_in, c_out, no_first_residual, key, tol):
        kx, k1, k2 = jax.random.split(key, 3)
        x = jax.random.normal(kx, (batch, c_in), jnp.float32)
        w1_t = _init_linear_weight_t(k1, c_in, 2 * c_out)
        w2_t = _init_linear_weight_t(k2, c_out, 2 * c_out)
        out = jax.block_until_ready(
            glu_block_forward(x, w1_t, w2_t,
                              no_first_residual=no_first_residual))
        ref = _reference(x, w1_t, w2_t, no_first_residual=no_first_residual)
        assert out.shape == (batch, c_out), out.shape
        err = float(jnp.max(jnp.abs(out - ref)))
        assert err < tol, f"max abs err {err} (tol {tol})"

    # 1) default GLUBlock: residual on both layers, in == out (split path).
    run_case(8, 32, 32, False, keys[0], 1e-4)
    # 2) no_first_residual, in != out, batch not a multiple of the tile
    #    (exercises the ragged last grid block).
    run_case(300, 48, 32, True, keys[1], 1e-4)
    # 3) 128-channel block: fused (RHS width 256) matmul path, multi-step grid.
    run_case(640, 128, 128, False, keys[2], 5e-4)

    print("KERNEL_OK")
</pallas_src>

<mosaic_0001>
module attributes {stable_mosaic.version = 11 : i64} {
  func.func @kernel(%arg0: i32, %arg1: memref<8x32xf32, #tpu.memory_space<vmem>>, %arg2: memref<32x32xf32, #tpu.memory_space<vmem>>, %arg3: memref<32x32xf32, #tpu.memory_space<vmem>>, %arg4: memref<32x32xf32, #tpu.memory_space<vmem>>, %arg5: memref<32x32xf32, #tpu.memory_space<vmem>>, %arg6: memref<8x32xf32, #tpu.memory_space<vmem>>) attributes {dimension_semantics = [#tpu.dimension_semantics<parallel>], iteration_bounds = array<i64: 1>, scalar_prefetch = 0 : i64, scratch_operands = 0 : i64, tpu.core_type = #tpu.core_type<tc>, window_params = [{transform_indices = @transform_0, window_bounds = array<i64: 8, 32>}, {pipeline_mode = #tpu.pipeline_mode<synchronous>, transform_indices = @transform_1, window_bounds = array<i64: 32, 32>}, {pipeline_mode = #tpu.pipeline_mode<synchronous>, transform_indices = @transform_2, window_bounds = array<i64: 32, 32>}, {pipeline_mode = #tpu.pipeline_mode<synchronous>, transform_indices = @transform_3, window_bounds = array<i64: 32, 32>}, {pipeline_mode = #tpu.pipeline_mode<synchronous>, transform_indices = @transform_4, window_bounds = array<i64: 32, 32>}, {transform_indices = @transform_5, window_bounds = array<i64: 8, 32>}]} {
    %c0 = arith.constant 0 : index
    %c0_0 = arith.constant 0 : index
    %0 = vector.load %arg1[%c0, %c0_0] : memref<8x32xf32, #tpu.memory_space<vmem>>, vector<8x32xf32>
    %c0_1 = arith.constant 0 : index
    %c0_2 = arith.constant 0 : index
    %1 = vector.load %arg2[%c0_1, %c0_2] : memref<32x32xf32, #tpu.memory_space<vmem>>, vector<32x32xf32>
    %cst = arith.constant dense<0.000000e+00> : vector<8x32xf32>
    %2 = tpu.matmul %0, %1, %cst {dimension_numbers = #tpu.dot_dimension_numbers<[1], [0], [0], [1], [0, 0, 1, 1], [], []>} : vector<8x32xf32>, vector<32x32xf32>, vector<8x32xf32> -> vector<8x32xf32>
    %c0_3 = arith.constant 0 : index
    %c0_4 = arith.constant 0 : index
    %3 = vector.load %arg3[%c0_3, %c0_4] : memref<32x32xf32, #tpu.memory_space<vmem>>, vector<32x32xf32>
    %cst_5 = arith.constant dense<0.000000e+00> : vector<8x32xf32>
    %4 = tpu.matmul %0, %3, %cst_5 {dimension_numbers = #tpu.dot_dimension_numbers<[1], [0], [0], [1], [0, 0, 1, 1], [], []>} : vector<8x32xf32>, vector<32x32xf32>, vector<8x32xf32> -> vector<8x32xf32>
    %5 = arith.negf %4 : vector<8x32xf32>
    %6 = math.exp %5 : vector<8x32xf32>
    %cst_6 = arith.constant 1.000000e+00 : f32
    %7 = vector.broadcast %cst_6 : f32 to vector<8x32xf32>
    %8 = arith.addf %7, %6 : vector<8x32xf32>
    %9 = arith.divf %7, %8 : vector<8x32xf32>
    %10 = arith.mulf %2, %9 : vector<8x32xf32>
    %cst_7 = arith.constant 0.707106769 : f32
    %11 = vector.broadcast %cst_7 : f32 to vector<8x32xf32>
    %12 = arith.mulf %0, %11 : vector<8x32xf32>
    %13 = arith.addf %12, %10 : vector<8x32xf32>
    %cst_8 = arith.constant 0.707106769 : f32
    %14 = vector.broadcast %cst_8 : f32 to vector<8x32xf32>
    %15 = arith.mulf %13, %14 : vector<8x32xf32>
    %c0_9 = arith.constant 0 : index
    %c0_10 = arith.constant 0 : index
    %16 = vector.load %arg4[%c0_9, %c0_10] : memref<32x32xf32, #tpu.memory_space<vmem>>, vector<32x32xf32>
    %cst_11 = arith.constant dense<0.000000e+00> : vector<8x32xf32>
    %17 = tpu.matmul %13, %16, %cst_11 {dimension_numbers = #tpu.dot_dimension_numbers<[1], [0], [0], [1], [0, 0, 1, 1], [], []>} : vector<8x32xf32>, vector<32x32xf32>, vector<8x32xf32> -> vector<8x32xf32>
    %c0_12 = arith.constant 0 : index
    %c0_13 = arith.constant 0 : index
    %18 = vector.load %arg5[%c0_12, %c0_13] : memref<32x32xf32, #tpu.memory_space<vmem>>, vector<32x32xf32>
    %cst_14 = arith.constant dense<0.000000e+00> : vector<8x32xf32>
    %19 = tpu.matmul %13, %18, %cst_14 {dimension_numbers = #tpu.dot_dimension_numbers<[1], [0], [0], [1], [0, 0, 1, 1], [], []>} : vector<8x32xf32>, vector<32x32xf32>, vector<8x32xf32> -> vector<8x32xf32>
    %20 = arith.negf %19 : vector<8x32xf32>
    %21 = math.exp %20 : vector<8x32xf32>
    %cst_15 = arith.constant 1.000000e+00 : f32
    %22 = vector.broadcast %cst_15 : f32 to vector<8x32xf32>
    %23 = arith.addf %22, %21 : vector<8x32xf32>
    %24 = arith.divf %22, %23 : vector<8x32xf32>
    %25 = arith.mulf %17, %24 : vector<8x32xf32>
    %26 = arith.addf %15, %25 : vector<8x32xf32>
    %c0_16 = arith.constant 0 : index
    %c0_17 = arith.constant 0 : index
    %27 = vector.load %arg6[%c0_16, %c0_17] : memref<8x32xf32, #tpu.memory_space<vmem>>, vector<8x32xf32>
    tpu.vector_store %arg6[%c0_16, %c0_17], %26 {strides = array<i32>} : memref<8x32xf32, #tpu.memory_space<vmem>>, vector<8x32xf32>,
    return
  }
  func.func @transform_0(%arg0: i32) -> (i32, i32) {
    %c0_i32 = arith.constant 0 : i32
    %c0_i32_0 = arith.constant 0 : i32
    return %arg0, %c0_i32 : i32, i32
  }
  func.func @transform_1(%arg0: i32) -> (i32, i32) {
    %c0_i32 = arith.constant 0 : i32
    %c0_i32_0 = arith.constant 0 : i32
    %c0_i32_1 = arith.constant 0 : i32
    return %c0_i32, %c0_i32_0 : i32, i32
  }
  func.func @transform_2(%arg0: i32) -> (i32, i32) {
    %c0_i32 = arith.constant 0 : i32
    %c0_i32_0 = arith.constant 0 : i32
    %c0_i32_1 = arith.constant 0 : i32
    return %c0_i32, %c0_i32_0 : i32, i32
  }
  func.func @transform_3(%arg0: i32) -> (i32, i32) {
    %c0_i32 = arith.constant 0 : i32
    %c0_i32_0 = arith.constant 0 : i32
    %c0_i32_1 = arith.constant 0 : i32
    return %c0_i32, %c0_i32_0 : i32, i32
  }
  func.func @transform_4(%arg0: i32) -> (i32, i32) {
    %c0_i32 = arith.constant 0 : i32
    %c0_i32_0 = arith.constant 0 : i32
    %c0_i32_1 = arith.constant 0 : i32
    return %c0_i32, %c0_i32_0 : i32, i32
  }
  func.func @transform_5(%arg0: i32) -> (i32, i32) {
    %c0_i32 = arith.constant 0 : i32
    %c0_i32_0 = arith.constant 0 : i32
    return %arg0, %c0_i32 : i32, i32
  }
}

</mosaic_0001>

<bundles_post_ra>
// kernel: tpu_custom_call.1
= control target key start
LH: loop header
LB: loop body
LE: loop exit
PB: predicated region body
PF: predicated region fallthrough
CT: control target
= control target key end

     0   :  { %10 = vsyncpa [#allocation3], 0  ;;  %s722_s0 = inlined_call_operand.hbm [shape: f32[8,32], index: 0, kind: input, shape index: {}]   ;;  %s723_s1 = inlined_call_operand.hbm [shape: f32[32,32], index: 1, kind: input, shape index: {}]   ;;  %s724_s2 = inlined_call_operand.hbm [shape: f32[32,32], index: 2, kind: input, shape index: {}]   ;;  %s725_s3 = inlined_call_operand.hbm [shape: f32[32,32], index: 3, kind: input, shape index: {}]   ;;  %s726_s4 = inlined_call_operand.hbm [shape: f32[32,32], index: 4, kind: input, shape index: {}]   ;;  %s727_s5 = inlined_call_operand.hbm [shape: f32[8,32], index: 5, kind: output, shape index: {}]  }
   0x1   :  { %11 = vsyncpa [#allocation6], 0 }
   0x2   :  { %12 = vsyncpa [#allocation9], 0 }
   0x3   :  { %13 = vsyncpa [#allocation4], 0  ;;  %s643_s18 = smov [#allocation5]  }
   0x4   :  { %s29_s19 = sshll.u32 %s643_s18, 4  ;;  %s30_s19 = int_to_ptr.vmem [resolvable:$true] %s29_s19 }
   0x5   :  { %s523_s20 = scalar_lea.vmem %s30_s19, 512  ;;  %p528_p1 = scmp.lt.s32.totalorder %s30_s19, %s30_s19 }
   0x6   :  { %p524_p0 = scmp.ne.s32.totalorder %s30_s19, %s523_s20  ;;  %p529_p2 = scmp.lt.s32.totalorder %s523_s20, %s523_s20 }
   0x8   :  { %p530_p3 = por %p529_p2, %p528_p1 }
   0xa   :  { %p531_p4 = pnand %p530_p3, %p524_p0 }
   0xc   :  { %534 = shalt.err (!%p531_p4)
}
   0xd   :  { %s644_s21 = smov 128   ;;  %s645_s22 = smov 8  }
   0xe   :  { %35 = dma.hbm_to_vmem [thread:$0]  %s723_s1, 512, %s30_s19, [#allocation6], %s644_s21, %s644_s21, %s645_s22  }
   0xf   :  { %s646_s25 = smov [#allocation8]   ;;  %s647_s27 = smov [#allocation2]  }
  0x10   :  { %s53_s26 = sshll.u32 %s646_s25, 4  ;;  %s20_s28 = sshll.u32 %s647_s27, 4  ;;  %s54_s26 = int_to_ptr.vmem [resolvable:$true] %s53_s26  ;;  %s21_s28 = int_to_ptr.vmem [resolvable:$true] %s20_s28 }
  0x11   :  { %s543_s29 = scalar_lea.vmem %s54_s26, 512  ;;  %p548_p6 = scmp.lt.s32.totalorder %s54_s26, %s54_s26 }
  0x12   :  { %p544_p5 = scmp.ne.s32.totalorder %s54_s26, %s543_s29  ;;  %p549_p7 = scmp.lt.s32.totalorder %s543_s29, %s543_s29 }
  0x14   :  { %p550_p8 = por %p549_p7, %p548_p6 }
  0x16   :  { %p551_p9 = pnand %p550_p8, %p544_p5 }
  0x18   :  { %554 = shalt.err (!%p551_p9)
}
  0x19   :  { %59 = dma.hbm_to_vmem [thread:$0]  %s725_s3, 512, %s54_s26, [#allocation9], %s644_s21, %s644_s21, %s645_s22  }
  0x1a   :  { %s563_s1 = scalar_lea.vmem %s21_s28, 128  ;;  %p568_p11 = scmp.lt.s32.totalorder %s21_s28, %s21_s28 }
  0x1b   :  { %p564_p10 = scmp.ne.s32.totalorder %s21_s28, %s563_s1  ;;  %p569_p12 = scmp.lt.s32.totalorder %s563_s1, %s563_s1 }
  0x1d   :  { %p570_p13 = por %p569_p12, %p568_p11 }
  0x1f   :  { %p571_p0 = pnand %p570_p13, %p564_p10 }
  0x21   :  { %574 = shalt.err (!%p571_p0)
}
  0x22   :  { %23 = dma.hbm_to_vmem [thread:$0]  %s722_s0, 128, %s21_s28, [#allocation3]  }
  0x23   :  { %s648_s9 = smov [#allocation7]   ;;  %s649_s11 = smov [#allocation10]  }
  0x24   :  { %s41_s10 = sshll.u32 %s648_s9, 4  ;;  %s65_s12 = sshll.u32 %s649_s11, 4  ;;  %s42_s10 = int_to_ptr.vmem [resolvable:$true] %s41_s10  ;;  %s66_s12 = int_to_ptr.vmem [resolvable:$true] %s65_s12 }
  0x25   :  { %s583_s13 = scalar_lea.vmem %s42_s10, 512  ;;  %p588_p2 = scmp.lt.s32.totalorder %s42_s10, %s42_s10 }
  0x26   :  { %p584_p1 = scmp.ne.s32.totalorder %s42_s10, %s583_s13  ;;  %p589_p3 = scmp.lt.s32.totalorder %s583_s13, %s583_s13 }
  0x28   :  { %p590_p4 = por %p589_p3, %p588_p2 }
  0x2a   :  { %p591_p5 = pnand %p590_p4, %p584_p1 }
  0x2c   :  { %594 = shalt.err (!%p591_p5)
}
  0x2d   :  { %47 = dma.hbm_to_vmem [thread:$0]  %s724_s2, 512, %s42_s10, [#allocation6], %s644_s21, %s644_s21, %s645_s22  }
  0x2e   :  { %s603_s0 = scalar_lea.vmem %s66_s12, 512  ;;  %p608_p7 = scmp.lt.s32.totalorder %s66_s12, %s66_s12 }
  0x2f   :  { %p604_p6 = scmp.ne.s32.totalorder %s66_s12, %s603_s0  ;;  %p609_p8 = scmp.lt.s32.totalorder %s603_s0, %s603_s0 }
  0x31   :  { %p610_p9 = por %p609_p8, %p608_p7 }
  0x33   :  { %p611_p10 = pnand %p610_p9, %p604_p6 }
  0x35   :  { %614 = shalt.err (!%p611_p10)
}
  0x36   :  { %71 = dma.hbm_to_vmem [thread:$0]  %s726_s4, 512, %s66_s12, [#allocation9], %s644_s21, %s644_s21, %s645_s22  }
  0x37   :  { %635 = dma.done.wait [#allocation3], 128  }
  0x38   :  { %636 = vsyncadd [#allocation3], 4294967168 }
  0x39   :  { %637 = dma.done.wait [#allocation6], 1024  }
  0x3a   :  { %638 = vsyncadd [#allocation6], 4294966272 }
  0x3b   :  { %639 = dma.done.wait [#allocation9], 1024  }
  0x3c   :  { %640 = vsyncadd [#allocation9], 4294966272  ;;  %v650_v0 = vmov 0.0   ;;  %vm651_vm0 = vmmov 0   ;;  %v169_v1 = vld [vmem:[#allocation7 + $0x18] sm:$0xff]  ;;  %v168_v2 = vld [vmem:[#allocation7 + $0x10] sm:$0xff] }
  0x3d   :  { %464 = vmatprep.subr.mxu1 %v650_v0  ;;  %472 = vmatprep.mubr.msk.f32.mxu1 %vm651_vm0, %v650_v0  ;;  %v91_v3 = vld [vmem:[#allocation5 + $0x18] sm:$0xff]  ;;  %v167_v4 = vld [vmem:[#allocation7 + $0x8] sm:$0xff]  ;;  %v90_v5 = vld [vmem:[#allocation5 + $0x10] sm:$0xff]  ;;  %vm92_vm1 = vcmask 261120   ;;  %s652_s2 = smov [#allocation11]  }
  0x3e   :  { %453 = vmatprep.subr.mxu0 %v650_v0  ;;  %461 = vmatprep.mubr.msk.f32.mxu0 %vm651_vm0, %v650_v0  ;;  %v89_v6 = vld [vmem:[#allocation5 + $0x8] sm:$0xff]  ;;  %v166_v7 = vld [vmem:[#allocation7] sm:$0xff]  ;;  %v87_v8 = vld [vmem:[#allocation2] sm:$0xff]  ;;  %s416_s4 = sshll.u32 %s652_s2, 4  ;;  %s417_s4 = int_to_ptr.vmem [resolvable:$true] %s416_s4 }
  0x3f   :  { %465 = vmatpush3.msra.mxu1 %v169_v1  ;;  %454 = vmatpush3.msra.mxu0 %v91_v3  ;;  %v88_v9 = vld [vmem:[#allocation5] sm:$0xff]  ;;  %v253_v10 = vld [vmem:[#allocation8 + $0x18] sm:$0xff]  ;;  %v252_v12 = vld [vmem:[#allocation8 + $0x10] sm:$0xff]  ;;  %v247_v25 = vmul.f32 0.70710677, %v87_v8  ;;  %s615_s17 = scalar_lea.vmem %s417_s4, 128  ;;  %p620_p12 = scmp.lt.s32.totalorder %s417_s4, %s417_s4 }
  0x40   :  { %466 = vmatprep.subr.mxu1 %v650_v0  ;;  %455 = vmatprep.subr.mxu0 %v650_v0  ;;  %v330_v11 = vld [vmem:[#allocation10 + $0x18] sm:$0xff]  ;;  %v329_v13 = vld [vmem:[#allocation10 + $0x10] sm:$0xff]  ;;  %v251_v14 = vld [vmem:[#allocation8 + $0x8] sm:$0xff]  ;;  %p616_p11 = scmp.ne.s32.totalorder %s417_s4, %s615_s17  ;;  %p621_p13 = scmp.lt.s32.totalorder %s615_s17, %s615_s17 }
  0x41   :  { %467 = vmatpush3.msra.mxu1 %v168_v2  ;;  %456 = vmatpush3.msra.mxu0 %v90_v5  ;;  %v328_v15 = vld [vmem:[#allocation10 + $0x8] sm:$0xff]  ;;  %v250_v16 = vld [vmem:[#allocation8] sm:$0xff] }
  0x42   :  { %468 = vmatprep.subr.mxu1 %v650_v0  ;;  %457 = vmatprep.subr.mxu0 %v650_v0  ;;  %v327_v17 = vld [vmem:[#allocation10] sm:$0xff]  ;;  %p622_p0 = por %p621_p13, %p620_p12 }
  0x43   :  { %469 = vmatpush3.msra.mxu1 %v167_v4  ;;  %458 = vmatpush3.msra.mxu0 %v89_v6 }
  0x44   :  { %470 = vmatprep.subr.mxu1 %v650_v0  ;;  %459 = vmatprep.subr.mxu0 %v650_v0  ;;  %p623_p1 = pnand %p622_p0, %p616_p11 }
  0x45   :  { %471 = vmatpush3.msra.mxu1 %v166_v7  ;;  %460 = vmatpush3.msra.mxu0 %v88_v9 }
  0x46   :  { %473 = vmatmul.mubr.msk.f32.vlgmr.msra.gmra.mxu1 %vm92_vm1, %v87_v8  ;;  %462 = vmatmul.mubr.msk.f32.vlgmr.msra.gmra.mxu0 %vm92_vm1, %v87_v8 }
  0x47   :  { %475 = vmatprep.subr.mxu0 %v650_v0  ;;  %486 = vmatprep.subr.mxu1 %v650_v0 }
  0x48   :  { %483 = vmatprep.mubr.msk.f32.mxu0 %vm651_vm0, %v650_v0  ;;  %494 = vmatprep.mubr.msk.f32.mxu1 %vm651_vm0, %v650_v0 }
  0x49   :  { %476 = vmatpush3.msra.mxu0 %v253_v10  ;;  %487 = vmatpush3.msra.mxu1 %v330_v11 }
  0x4a   :  { %477 = vmatprep.subr.mxu0 %v650_v0  ;;  %488 = vmatprep.subr.mxu1 %v650_v0 }
  0x4b   :  { %478 = vmatpush3.msra.mxu0 %v252_v12  ;;  %489 = vmatpush3.msra.mxu1 %v329_v13 }
  0x4c   :  { %479 = vmatprep.subr.mxu0 %v650_v0  ;;  %490 = vmatprep.subr.mxu1 %v650_v0 }
  0x4d   :  { %480 = vmatpush3.msra.mxu0 %v251_v14  ;;  %491 = vmatpush3.msra.mxu1 %v328_v15 }
  0x4e   :  { %481 = vmatprep.subr.mxu0 %v650_v0  ;;  %492 = vmatprep.subr.mxu1 %v650_v0 }
  0x4f   :  { %482 = vmatpush3.msra.mxu0 %v250_v16  ;;  %493 = vmatpush3.msra.mxu1 %v327_v17 }
 0x106   :  { %v236_v18 = vpop.f32.mrf.mxu1  ;;  %v162_v20 = vpop.f32.mrf.mxu0 }
 0x107   :  { %v429_v19 = vmul.f32 -1.442695, %v236_v18 }
 0x108   :  { %v474_v21 = vpop.f32.mrf.mxu1  ;;  %v463_v22 = vpop.f32.mrf.mxu0 }
 0x109   :  { %507 = vpow2.f32 %v429_v19 }
 0x116   :  { %v508_v23 = vpop.eup %507 }
 0x117   :  { %v243_v24 = vadd.f32 1.0, %v508_v23 }
 0x119   :  { %509 = vrcp.f32 %v243_v24 }
 0x126   :  { %v510_v26 = vpop.eup %509 }
 0x127   :  { %v246_v27 = vmul.f32 %v510_v26, %v162_v20 }
 0x129   :  { %v248_v28 = vadd.f32 %v247_v25, %v246_v27 }
 0x12b   :  { %484 = vmatmul.mubr.msk.f32.vlgmr.msra.gmra.mxu0 %vm92_vm1, %v248_v28  ;;  %495 = vmatmul.mubr.msk.f32.vlgmr.msra.gmra.mxu1 %vm92_vm1, %v248_v28  ;;  %v249_v37 = vmul.f32 0.70710677, %v248_v28 }
 0x1eb   :  { %v323_v29 = vpop.f32.mrf.mxu0  ;;  %v397_v30 = vpop.f32.mrf.mxu1 }
 0x1ec   :  { %v432_v31 = vmul.f32 -1.442695, %v397_v30 }
 0x1ed   :  { %v485_v32 = vpop.f32.mrf.mxu0  ;;  %v496_v33 = vpop.f32.mrf.mxu1 }
 0x1ee   :  { %511 = vpow2.f32 %v432_v31 }
 0x1fb   :  { %v512_v34 = vpop.eup %511 }
 0x1fc   :  { %v404_v35 = vadd.f32 1.0, %v512_v34 }
 0x1fe   :  { %513 = vrcp.f32 %v404_v35 }
 0x20b   :  { %v514_v36 = vpop.eup %513 }
 0x20c   :  { %v407_v38 = vmul.f32 %v514_v36, %v323_v29 }
 0x20e   :  { %v408_v39 = vadd.f32 %v407_v38, %v249_v37 }
 0x210   :  { %409 = vst.msk [vmem:[#allocation11] sm:$0xff] %vm92_vm1, %v408_v39 }
 0x211   :  { %626 = shalt.err (!%p623_p1)
}
 0x212   :  { %419 = dma.vmem_to_hbm [thread:$0]  %s417_s4, 128, %s727_s5, [#allocation4]  }
 0x213   :  { %641 = dma.done.wait [#allocation4], 128  }
 0x214   :  { %642 = vsyncadd [#allocation4], 4294967168 }
 0x215   :  { %423 = vsyncpa [#allocation3], 1 }
 0x216   :  { %424 = vsyncpa [#allocation6], 1 }
 0x217   :  { %425 = vsyncpa [#allocation9], 1 }
 0x218   :  { %426 = vsyncpa [#allocation4], 1 }

</bundles_post_ra>
